<compile_context>
chip_gen: v7x
topology: tpu7x:2x2x1
jax: 0.10.0
libtpu: 0.0.40
codegen_flags: <defaults>
</compile_context>

<pallas_src>
import functools
import math

import jax
import jax.numpy as jnp
import numpy as np
from jax.experimental import pallas as pl
from jax.experimental.pallas import tpu as pltpu

# ---- model hyper-parameters (small, consistent with the module) ----
D_MODEL = 32
NHEAD = 4
DFF = 64
HEAD_DIM = D_MODEL // NHEAD
SEQ = 8
BATCH = 2
MAX_SEQ = 64
EPS = 1e-5          # nn.LayerNorm default
LANES = 128         # packed-slab lane width


def _align8(r):
    return (r + 7) // 8 * 8


def _slab_layout(n):
    """Row offsets of every parameter group inside the packed (rows, 128) slab.

    Every group starts on an 8-sublane boundary (review item: no unaligned sublane extracts).
    """
    assert 4 * D_MODEL <= LANES
    assert DFF <= LANES
    assert D_MODEL + NHEAD * n <= LANES            # pe | additive batch mask share one row block
    assert D_MODEL + DFF + D_MODEL <= LANES        # bo | b1 | b2 share one bias row
    r_wqkv = 0                                     # rows [0, D): [Wqkv (D,3D) | Wo (D,D)]
    r_w1 = _align8(r_wqkv + D_MODEL)               # rows [.., +D): W1 (D, DFF)
    r_w2 = _align8(r_w1 + D_MODEL)                 # rows [.., +DFF): W2 (DFF, D)
    r_mv = _align8(r_w2 + DFF)                     # rows [.., +H*n): maskV (H*n, D)
    r_pe = _align8(r_mv + NHEAD * n)               # rows [.., +n): [pe (n,D) | addmask (n,H*n)]
    r_bq = _align8(r_pe + n)                       # 1 row: bqkv (3D)
    r_bo = r_bq + 8                                # 1 row: [bo (D) | b1 (DFF) | b2 (D)]
    rows = r_bo + 8
    return dict(r_w1=r_w1, r_w2=r_w2, r_mv=r_mv, r_pe=r_pe, r_bq=r_bq, r_bo=r_bo, rows=rows)


def _normalize(v):
    """LayerNorm without affine (gamma/beta are folded into the downstream weights)."""
    mu = jnp.mean(v, axis=-1, keepdims=True)
    c = v - mu
    var = jnp.mean(c * c, axis=-1, keepdims=True)
    return c * jax.lax.rsqrt(var + EPS)


def _gelu_exact(x):
    # nn.GELU() default = exact erf formulation
    return 0.5 * x * (1.0 + jax.lax.erf(x * (1.0 / math.sqrt(2.0))))


def transformer_block_kernel(x_ref, p_ref, o_ref, *, r_w1, r_w2, r_mv, r_pe, r_bq, r_bo):
    """One invocation over the full (batch*seq, d_model) activation slab.

    p_ref is the single packed parameter slab (see _slab_layout). All slices below are static
    and start on 8-sublane boundaries.
    """
    n = x_ref.shape[0]                 # batch * seq (static)
    hn = NHEAD * n
    D = D_MODEL

    wqkv = p_ref[0:D, 0:3 * D]                         # (D, 3D)  LN1-affine + q-scale folded
    wo = p_ref[0:D, 3 * D:4 * D]                       # (D, D)
    w1 = p_ref[r_w1:r_w1 + D, 0:DFF]                   # (D, DFF) LN2-affine folded
    w2 = p_ref[r_w2:r_w2 + DFF, 0:D]                   # (DFF, D)
    maskv = p_ref[r_mv:r_mv + hn, 0:D]                 # (H*n, D) head-selection 0/1 mask
    pe = p_ref[r_pe:r_pe + n, 0:D]                     # (n, D)   positional encoding (per token)
    addm = p_ref[r_pe:r_pe + n, D:D + hn]              # (n, H*n) 0 / -1e30 cross-batch mask
    bqkv = p_ref[r_bq:r_bq + 1, 0:3 * D]               # (1, 3D)
    bo = p_ref[r_bo:r_bo + 1, 0:D]                     # (1, D)
    b1 = p_ref[r_bo:r_bo + 1, D:D + DFF]               # (1, DFF)
    b2 = p_ref[r_bo:r_bo + 1, D + DFF:D + DFF + D]     # (1, D)

    x = x_ref[...] + pe                                # positional encoding (dropout == identity)

    # ---------- norm1 + multi-head self-attention (fully 2-D, heads along lanes) ----------
    h = _normalize(x)                                  # (n, D)
    qkv = jnp.dot(h, wqkv, preferred_element_type=jnp.float32) + bqkv      # (n, 3D), lane-dense
    q = qkv[:, 0:D]                                    # 1/sqrt(hd) already folded into Wq/bq
    k = qkv[:, D:2 * D]
    v = qkv[:, 2 * D:3 * D]

    # Block-diagonal K / V: row block h keeps only head h's feature columns, so one 2-D matmul
    # computes every head's scores / context without any head broadcast or leading-dim transpose.
    kbd = jnp.concatenate([k] * NHEAD, axis=0) * maskv  # (H*n, D)
    vbd = jnp.concatenate([v] * NHEAD, axis=0) * maskv  # (H*n, D)

    s = jnp.einsum("id,jd->ij", q, kbd, preferred_element_type=jnp.float32)  # (n, H*n)
    s = s + addm                                        # tokens attend only within their batch
    # Per-row global max is a valid per-head-segment shift (softmax is shift-invariant per row).
    s = s - jnp.max(s, axis=-1, keepdims=True)
    e = jnp.exp(s)

    ctx = jnp.dot(e, vbd, preferred_element_type=jnp.float32)    # (n, D) unnormalized, heads concat
    den = jnp.dot(e, maskv, preferred_element_type=jnp.float32)  # (n, D) per-head softmax denom
    ctx = ctx * pl.reciprocal(den, approx=True)                  # EUP reciprocal (documented drift)

    attn = jnp.dot(ctx, wo, preferred_element_type=jnp.float32) + bo  # head reduction inside MXU
    x = x + attn                                        # dropout1 == identity

    # ---------- norm2 + feed-forward ----------
    h2 = _normalize(x)
    f = jnp.dot(h2, w1, preferred_element_type=jnp.float32) + b1
    f = _gelu_exact(f)                                  # inner dropout == identity
    y = jnp.dot(f, w2, preferred_element_type=jnp.float32) + b2
    o_ref[...] = x + y                                  # dropout2 == identity
    # TODO(synk): at larger n, present a >=128-lane-wide output view to avoid masked vst stores.


@jax.jit
def transformer_block(src, params):
    batch = src.shape[0]
    seq = src.shape[1] // D_MODEL
    n = batch * seq
    lay = _slab_layout(n)
    D = D_MODEL

    x = src.reshape(n, D).astype(jnp.float32)

    # ---- wrapper-side parameter folding (free constant work, off the kernel critical path) ----
    g1, be1 = params["ln1w"][0], params["ln1b"][0]
    g2, be2 = params["ln2w"][0], params["ln2b"][0]
    qs = 1.0 / math.sqrt(HEAD_DIM)

    wqkv = jnp.concatenate([params["wq"].T * qs, params["wk"].T, params["wv"].T], axis=1)  # (D,3D)
    bqkv = jnp.concatenate([params["bq"][0] * qs, params["bk"][0], params["bv"][0]], axis=0)
    wqkv_f = g1[:, None] * wqkv                     # fold LN1 gamma
    bqkv_f = be1 @ wqkv + bqkv                      # fold LN1 beta

    w1t = params["w1"].T                            # (D, DFF)
    w1_f = g2[:, None] * w1t                        # fold LN2 gamma
    b1_f = be2 @ w1t + params["b1"][0]              # fold LN2 beta

    # ---- precomputed masks + positional encoding (no iota // seq in-kernel) ----
    head_row = jnp.repeat(jnp.arange(NHEAD), n)                   # (H*n,)
    head_col = jnp.arange(D) // HEAD_DIM                          # (D,)
    maskv = (head_row[:, None] == head_col[None, :]).astype(jnp.float32)   # (H*n, D)

    tokb = jnp.arange(n) // seq
    same_batch = tokb[:, None] == tokb[None, :]                   # (n, n)
    addm = jnp.where(jnp.tile(same_batch, (1, NHEAD)), 0.0, -1e30).astype(jnp.float32)  # (n, H*n)

    pe = jnp.tile(params["pe"][:seq], (batch, 1))                 # (n, D), batch-major tokens

    # ---- single packed, 128-lane, 8-row-aligned parameter slab (1 DMA) ----
    slab = jnp.zeros((lay["rows"], LANES), jnp.float32)
    slab = slab.at[0:D, 0:3 * D].set(wqkv_f)
    slab = slab.at[0:D, 3 * D:4 * D].set(params["wo"].T)
    slab = slab.at[lay["r_w1"]:lay["r_w1"] + D, 0:DFF].set(w1_f)
    slab = slab.at[lay["r_w2"]:lay["r_w2"] + DFF, 0:D].set(params["w2"].T)
    slab = slab.at[lay["r_mv"]:lay["r_mv"] + NHEAD * n, 0:D].set(maskv)
    slab = slab.at[lay["r_pe"]:lay["r_pe"] + n, 0:D].set(pe)
    slab = slab.at[lay["r_pe"]:lay["r_pe"] + n, D:D + NHEAD * n].set(addm)
    slab = slab.at[lay["r_bq"], 0:3 * D].set(bqkv_f)
    slab = slab.at[lay["r_bo"], 0:D].set(params["bo"][0])
    slab = slab.at[lay["r_bo"], D:D + DFF].set(b1_f)
    slab = slab.at[lay["r_bo"], D + DFF:D + DFF + D].set(params["b2"][0])

    kernel = functools.partial(
        transformer_block_kernel,
        r_w1=lay["r_w1"], r_w2=lay["r_w2"], r_mv=lay["r_mv"],
        r_pe=lay["r_pe"], r_bq=lay["r_bq"], r_bo=lay["r_bo"])

    out = pl.pallas_call(
        kernel,
        grid=(1,),   # TODO(synk): grid over batch tiles ("parallel") when batch*seq scales (v7x 2 TCs)
        in_specs=[pl.BlockSpec((n, D), lambda i: (0, 0)),
                  pl.BlockSpec((lay["rows"], LANES), lambda i: (0, 0))],
        out_specs=pl.BlockSpec((n, D), lambda i: (0, 0)),
        out_shape=jax.ShapeDtypeStruct((n, D), jnp.float32),
        compiler_params=pltpu.CompilerParams(dimension_semantics=("arbitrary",)),
    )(x, slab)

    return out.reshape(batch, seq * D)


def init_params(key):
    def linear(k, out_dim, in_dim):
        bound = 1.0 / math.sqrt(in_dim)
        kw, kb = jax.random.split(k)
        w = jax.random.uniform(kw, (out_dim, in_dim), jnp.float32, -bound, bound)
        b = jax.random.uniform(kb, (1, out_dim), jnp.float32, -bound, bound)
        return w, b

    keys = jax.random.split(key, 6)
    wq, bq = linear(keys[0], D_MODEL, D_MODEL)
    wk, bk = linear(keys[1], D_MODEL, D_MODEL)
    wv, bv = linear(keys[2], D_MODEL, D_MODEL)
    wo, bo = linear(keys[3], D_MODEL, D_MODEL)
    w1, b1 = linear(keys[4], DFF, D_MODEL)
    w2, b2 = linear(keys[5], D_MODEL, DFF)

    # PositionalEncoding buffer
    pos = jnp.arange(MAX_SEQ, dtype=jnp.float32)[:, None]
    div = jnp.exp(jnp.arange(0, D_MODEL, 2, dtype=jnp.float32) * (-math.log(10000.0) / D_MODEL))
    pe = jnp.zeros((MAX_SEQ, D_MODEL), jnp.float32)
    pe = pe.at[:, 0::2].set(jnp.sin(pos * div))
    pe = pe.at[:, 1::2].set(jnp.cos(pos * div))

    return dict(
        pe=pe,
        ln1w=jnp.ones((1, D_MODEL), jnp.float32), ln1b=jnp.zeros((1, D_MODEL), jnp.float32),
        wq=wq, wk=wk, wv=wv, bq=bq, bk=bk, bv=bv, wo=wo, bo=bo,
        ln2w=jnp.ones((1, D_MODEL), jnp.float32), ln2b=jnp.zeros((1, D_MODEL), jnp.float32),
        w1=w1, b1=b1, w2=w2, b2=b2,
    )


def reference(src, params):
    """Pure-JAX reference replicating the PyTorch forward (eval mode)."""
    batch = src.shape[0]
    seq = src.shape[1] // D_MODEL
    x = src.reshape(batch, seq, D_MODEL).astype(jnp.float32)
    x = x + params["pe"][:seq][None]

    def ln(v, w, b):
        mu = v.mean(-1, keepdims=True)
        var = ((v - mu) ** 2).mean(-1, keepdims=True)
        return (v - mu) / jnp.sqrt(var + EPS) * w + b

    h = ln(x, params["ln1w"][0], params["ln1b"][0])
    q = h @ params["wq"].T + params["bq"][0]
    k = h @ params["wk"].T + params["bk"][0]
    v = h @ params["wv"].T + params["bv"][0]
    qh = q.reshape(batch, seq, NHEAD, HEAD_DIM).transpose(0, 2, 1, 3) / math.sqrt(HEAD_DIM)
    kh = k.reshape(batch, seq, NHEAD, HEAD_DIM).transpose(0, 2, 1, 3)
    vh = v.reshape(batch, seq, NHEAD, HEAD_DIM).transpose(0, 2, 1, 3)
    s = jnp.einsum("bhqd,bhkd->bhqk", qh, kh)
    p = jax.nn.softmax(s, axis=-1)
    ctx = jnp.einsum("bhqk,bhkd->bhqd", p, vh).transpose(0, 2, 1, 3).reshape(batch, seq, D_MODEL)
    x = x + (ctx @ params["wo"].T + params["bo"][0])
    h2 = ln(x, params["ln2w"][0], params["ln2b"][0])
    f = jax.nn.gelu(h2 @ params["w1"].T + params["b1"][0], approximate=False)
    x = x + (f @ params["w2"].T + params["b2"][0])
    return x.reshape(batch, -1)


if __name__ == "__main__":
    key = jax.random.PRNGKey(0)
    kp, kx = jax.random.split(key)
    params = init_params(kp)

    n_in = SEQ * D_MODEL
    src = jax.random.normal(kx, (BATCH, n_in), jnp.float32)     # [batch, n_in]

    out = transformer_block(src, params)
    out = jax.block_until_ready(out)

    ref = jax.block_until_ready(reference(src, params))
    assert out.shape == (BATCH, n_in)
    # tolerance relaxed to 1e-3 to accommodate the approx (EUP) softmax reciprocal (intentional drift)
    np.testing.assert_allclose(np.asarray(out), np.asarray(ref), atol=1e-3, rtol=1e-3)
    print("KERNEL_OK")
</pallas_src>

<mosaic_0001>
module attributes {stable_mosaic.version = 11 : i64} {
  func.func @transformer_block_kernel(%arg0: i32, %arg1: memref<16x32xf32, #tpu.memory_space<vmem>>, %arg2: memref<224x128xf32, #tpu.memory_space<vmem>>, %arg3: memref<16x32xf32, #tpu.memory_space<vmem>>) attributes {dimension_semantics = [#tpu.dimension_semantics<arbitrary>], iteration_bounds = array<i64: 1>, scalar_prefetch = 0 : i64, scratch_operands = 0 : i64, tpu.core_type = #tpu.core_type<tc>, window_params = [{pipeline_mode = #tpu.pipeline_mode<synchronous>, transform_indices = @transform_0, window_bounds = array<i64: 16, 32>}, {pipeline_mode = #tpu.pipeline_mode<synchronous>, transform_indices = @transform_1, window_bounds = array<i64: 224, 128>}, {pipeline_mode = #tpu.pipeline_mode<synchronous>, transform_indices = @transform_2, window_bounds = array<i64: 16, 32>}]} {
    %c0 = arith.constant 0 : index
    %c0_0 = arith.constant 0 : index
    %0 = vector.load %arg2[%c0, %c0_0] : memref<224x128xf32, #tpu.memory_space<vmem>>, vector<32x96xf32>
    %c0_1 = arith.constant 0 : index
    %c96 = arith.constant 96 : index
    %1 = vector.load %arg2[%c0_1, %c96] : memref<224x128xf32, #tpu.memory_space<vmem>>, vector<32x32xf32>
    %c32 = arith.constant 32 : index
    %c0_2 = arith.constant 0 : index
    %2 = vector.load %arg2[%c32, %c0_2] : memref<224x128xf32, #tpu.memory_space<vmem>>, vector<32x64xf32>
    %c64 = arith.constant 64 : index
    %c0_3 = arith.constant 0 : index
    %3 = vector.load %arg2[%c64, %c0_3] : memref<224x128xf32, #tpu.memory_space<vmem>>, vector<64x32xf32>
    %c128 = arith.constant 128 : index
    %c0_4 = arith.constant 0 : index
    %4 = vector.load %arg2[%c128, %c0_4] : memref<224x128xf32, #tpu.memory_space<vmem>>, vector<64x32xf32>
    %c192 = arith.constant 192 : index
    %c0_5 = arith.constant 0 : index
    %5 = vector.load %arg2[%c192, %c0_5] : memref<224x128xf32, #tpu.memory_space<vmem>>, vector<16x32xf32>
    %c192_6 = arith.constant 192 : index
    %c32_7 = arith.constant 32 : index
    %6 = vector.load %arg2[%c192_6, %c32_7] : memref<224x128xf32, #tpu.memory_space<vmem>>, vector<16x64xf32>
    %c208 = arith.constant 208 : index
    %c0_8 = arith.constant 0 : index
    %7 = vector.load %arg2[%c208, %c0_8] : memref<224x128xf32, #tpu.memory_space<vmem>>, vector<1x96xf32>
    %c216 = arith.constant 216 : index
    %c0_9 = arith.constant 0 : index
    %8 = vector.load %arg2[%c216, %c0_9] : memref<224x128xf32, #tpu.memory_space<vmem>>, vector<1x32xf32>
    %c216_10 = arith.constant 216 : index
    %c32_11 = arith.constant 32 : index
    %9 = vector.load %arg2[%c216_10, %c32_11] : memref<224x128xf32, #tpu.memory_space<vmem>>, vector<1x64xf32>
    %c216_12 = arith.constant 216 : index
    %c96_13 = arith.constant 96 : index
    %10 = vector.load %arg2[%c216_12, %c96_13] : memref<224x128xf32, #tpu.memory_space<vmem>>, vector<1x32xf32>
    %c0_14 = arith.constant 0 : index
    %c0_15 = arith.constant 0 : index
    %11 = vector.load %arg1[%c0_14, %c0_15] : memref<16x32xf32, #tpu.memory_space<vmem>>, vector<16x32xf32>
    %12 = arith.addf %11, %5 : vector<16x32xf32>
    %cst = arith.constant dense<0.000000e+00> : vector<16xf32>
    %13 = vector.multi_reduction <add>, %12, %cst [1] : vector<16x32xf32> to vector<16xf32>
    %14 = vector.shape_cast %13 : vector<16xf32> to vector<16x1xf32>
    %cst_16 = arith.constant 3.200000e+01 : f32
    %15 = vector.broadcast %cst_16 : f32 to vector<16x1xf32>
    %16 = arith.divf %14, %15 : vector<16x1xf32>
    %17 = vector.broadcast %16 : vector<16x1xf32> to vector<16x32xf32>
    %18 = arith.subf %12, %17 : vector<16x32xf32>
    %19 = arith.mulf %18, %18 : vector<16x32xf32>
    %cst_17 = arith.constant dense<0.000000e+00> : vector<16xf32>
    %20 = vector.multi_reduction <add>, %19, %cst_17 [1] : vector<16x32xf32> to vector<16xf32>
    %21 = vector.shape_cast %20 : vector<16xf32> to vector<16x1xf32>
    %cst_18 = arith.constant 3.200000e+01 : f32
    %22 = vector.broadcast %cst_18 : f32 to vector<16x1xf32>
    %23 = arith.divf %21, %22 : vector<16x1xf32>
    %cst_19 = arith.constant 9.99999974E-6 : f32
    %24 = vector.broadcast %cst_19 : f32 to vector<16x1xf32>
    %25 = arith.addf %23, %24 : vector<16x1xf32>
    %26 = math.rsqrt %25 : vector<16x1xf32>
    %27 = vector.broadcast %26 : vector<16x1xf32> to vector<16x32xf32>
    %28 = arith.mulf %18, %27 : vector<16x32xf32>
    %cst_20 = arith.constant dense<0.000000e+00> : vector<16x96xf32>
    %29 = tpu.matmul %28, %0, %cst_20 {dimension_numbers = #tpu.dot_dimension_numbers<[1], [0], [0], [1], [0, 0, 1, 1], [], []>} : vector<16x32xf32>, vector<32x96xf32>, vector<16x96xf32> -> vector<16x96xf32>
    %30 = vector.broadcast %7 : vector<1x96xf32> to vector<16x96xf32>
    %31 = arith.addf %29, %30 : vector<16x96xf32>
    %32 = vector.extract_strided_slice %31 {offsets = [0, 0], sizes = [16, 32], strides = [1, 1]} : vector<16x96xf32> to vector<16x32xf32>
    %33 = vector.extract_strided_slice %31 {offsets = [0, 32], sizes = [16, 32], strides = [1, 1]} : vector<16x96xf32> to vector<16x32xf32>
    %34 = vector.extract_strided_slice %31 {offsets = [0, 64], sizes = [16, 32], strides = [1, 1]} : vector<16x96xf32> to vector<16x32xf32>
    %35 = tpu.concatenate %33, %33, %33, %33 in 0 : vector<16x32xf32>, vector<16x32xf32>, vector<16x32xf32>, vector<16x32xf32> -> vector<64x32xf32>
    %36 = arith.mulf %35, %4 : vector<64x32xf32>
    %37 = tpu.concatenate %34, %34, %34, %34 in 0 : vector<16x32xf32>, vector<16x32xf32>, vector<16x32xf32>, vector<16x32xf32> -> vector<64x32xf32>
    %38 = arith.mulf %37, %4 : vector<64x32xf32>
    "tpu.trace_start"() <{level = 10 : i32, message = "id,jd->ij"}> : () -> ()
    %cst_21 = arith.constant dense<0.000000e+00> : vector<16x64xf32>
    %39 = tpu.matmul %32, %36, %cst_21 {dimension_numbers = #tpu.dot_dimension_numbers<[1], [1], [0], [0], [0, 0, 1, 0], [], []>} : vector<16x32xf32>, vector<64x32xf32>, vector<16x64xf32> -> vector<16x64xf32>
    "tpu.trace_stop"() : () -> ()
    %40 = arith.addf %39, %6 : vector<16x64xf32>
    %cst_22 = arith.constant dense<0xFF800000> : vector<16xf32>
    %41 = vector.multi_reduction <maximumf>, %40, %cst_22 [1] : vector<16x64xf32> to vector<16xf32>
    %42 = vector.shape_cast %41 : vector<16xf32> to vector<16x1xf32>
    %43 = vector.broadcast %42 : vector<16x1xf32> to vector<16x64xf32>
    %44 = arith.subf %40, %43 : vector<16x64xf32>
    %45 = math.exp %44 : vector<16x64xf32>
    %cst_23 = arith.constant dense<0.000000e+00> : vector<16x32xf32>
    %46 = tpu.matmul %45, %38, %cst_23 {dimension_numbers = #tpu.dot_dimension_numbers<[1], [0], [0], [1], [0, 0, 1, 1], [], []>} : vector<16x64xf32>, vector<64x32xf32>, vector<16x32xf32> -> vector<16x32xf32>
    %cst_24 = arith.constant dense<0.000000e+00> : vector<16x32xf32>
    %47 = tpu.matmul %45, %4, %cst_24 {dimension_numbers = #tpu.dot_dimension_numbers<[1], [0], [0], [1], [0, 0, 1, 1], [], []>} : vector<16x64xf32>, vector<64x32xf32>, vector<16x32xf32> -> vector<16x32xf32>
    %48 = tpu.reciprocal %47 {approx = true} : vector<16x32xf32> -> vector<16x32xf32>
    %49 = arith.mulf %46, %48 : vector<16x32xf32>
    %cst_25 = arith.constant dense<0.000000e+00> : vector<16x32xf32>
    %50 = tpu.matmul %49, %1, %cst_25 {dimension_numbers = #tpu.dot_dimension_numbers<[1], [0], [0], [1], [0, 0, 1, 1], [], []>} : vector<16x32xf32>, vector<32x32xf32>, vector<16x32xf32> -> vector<16x32xf32>
    %51 = vector.broadcast %8 : vector<1x32xf32> to vector<16x32xf32>
    %52 = arith.addf %50, %51 : vector<16x32xf32>
    %53 = arith.addf %12, %52 : vector<16x32xf32>
    %cst_26 = arith.constant dense<0.000000e+00> : vector<16xf32>
    %54 = vector.multi_reduction <add>, %53, %cst_26 [1] : vector<16x32xf32> to vector<16xf32>
    %55 = vector.shape_cast %54 : vector<16xf32> to vector<16x1xf32>
    %cst_27 = arith.constant 3.200000e+01 : f32
    %56 = vector.broadcast %cst_27 : f32 to vector<16x1xf32>
    %57 = arith.divf %55, %56 : vector<16x1xf32>
    %58 = vector.broadcast %57 : vector<16x1xf32> to vector<16x32xf32>
    %59 = arith.subf %53, %58 : vector<16x32xf32>
    %60 = arith.mulf %59, %59 : vector<16x32xf32>
    %cst_28 = arith.constant dense<0.000000e+00> : vector<16xf32>
    %61 = vector.multi_reduction <add>, %60, %cst_28 [1] : vector<16x32xf32> to vector<16xf32>
    %62 = vector.shape_cast %61 : vector<16xf32> to vector<16x1xf32>
    %cst_29 = arith.constant 3.200000e+01 : f32
    %63 = vector.broadcast %cst_29 : f32 to vector<16x1xf32>
    %64 = arith.divf %62, %63 : vector<16x1xf32>
    %cst_30 = arith.constant 9.99999974E-6 : f32
    %65 = vector.broadcast %cst_30 : f32 to vector<16x1xf32>
    %66 = arith.addf %64, %65 : vector<16x1xf32>
    %67 = math.rsqrt %66 : vector<16x1xf32>
    %68 = vector.broadcast %67 : vector<16x1xf32> to vector<16x32xf32>
    %69 = arith.mulf %59, %68 : vector<16x32xf32>
    %cst_31 = arith.constant dense<0.000000e+00> : vector<16x64xf32>
    %70 = tpu.matmul %69, %2, %cst_31 {dimension_numbers = #tpu.dot_dimension_numbers<[1], [0], [0], [1], [0, 0, 1, 1], [], []>} : vector<16x32xf32>, vector<32x64xf32>, vector<16x64xf32> -> vector<16x64xf32>
    %71 = vector.broadcast %9 : vector<1x64xf32> to vector<16x64xf32>
    %72 = arith.addf %70, %71 : vector<16x64xf32>
    %cst_32 = arith.constant 5.000000e-01 : f32
    %73 = vector.broadcast %cst_32 : f32 to vector<16x64xf32>
    %74 = arith.mulf %73, %72 : vector<16x64xf32>
    %cst_33 = arith.constant 0.707106769 : f32
    %75 = vector.broadcast %cst_33 : f32 to vector<16x64xf32>
    %76 = arith.mulf %72, %75 : vector<16x64xf32>
    %77 = math.erf %76 : vector<16x64xf32>
    %cst_34 = arith.constant 1.000000e+00 : f32
    %78 = vector.broadcast %cst_34 : f32 to vector<16x64xf32>
    %79 = arith.addf %78, %77 : vector<16x64xf32>
    %80 = arith.mulf %74, %79 : vector<16x64xf32>
    %cst_35 = arith.constant dense<0.000000e+00> : vector<16x32xf32>
    %81 = tpu.matmul %80, %3, %cst_35 {dimension_numbers = #tpu.dot_dimension_numbers<[1], [0], [0], [1], [0, 0, 1, 1], [], []>} : vector<16x64xf32>, vector<64x32xf32>, vector<16x32xf32> -> vector<16x32xf32>
    %82 = vector.broadcast %10 : vector<1x32xf32> to vector<16x32xf32>
    %83 = arith.addf %81, %82 : vector<16x32xf32>
    %84 = arith.addf %53, %83 : vector<16x32xf32>
    %c0_36 = arith.constant 0 : index
    %c0_37 = arith.constant 0 : index
    %85 = vector.load %arg3[%c0_36, %c0_37] : memref<16x32xf32, #tpu.memory_space<vmem>>, vector<16x32xf32>
    tpu.vector_store %arg3[%c0_36, %c0_37], %84 {strides = array<i32>} : memref<16x32xf32, #tpu.memory_space<vmem>>, vector<16x32xf32>,
    return
  }
  func.func @transform_0(%arg0: i32) -> (i32, i32) {
    %c0_i32 = arith.constant 0 : i32
    %c0_i32_0 = arith.constant 0 : i32
    %c0_i32_1 = arith.constant 0 : i32
    return %c0_i32, %c0_i32_0 : i32, i32
  }
  func.func @transform_1(%arg0: i32) -> (i32, i32) {
    %c0_i32 = arith.constant 0 : i32
    %c0_i32_0 = arith.constant 0 : i32
    %c0_i32_1 = arith.constant 0 : i32
    return %c0_i32, %c0_i32_0 : i32, i32
  }
  func.func @transform_2(%arg0: i32) -> (i32, i32) {
    %c0_i32 = arith.constant 0 : i32
    %c0_i32_0 = arith.constant 0 : i32
    %c0_i32_1 = arith.constant 0 : i32
    return %c0_i32, %c0_i32_0 : i32, i32
  }
}

</mosaic_0001>

<bundles_post_ra>
// kernel: eq.15
= control target key start
LH: loop header
LB: loop body
LE: loop exit
PB: predicated region body
PF: predicated region fallthrough
CT: control target
= control target key end

     0   :  { %vm7_vm0 = vcmask 130048   ;;  %s37_s8 = smov 16   ;;  %s38_s9 = smov 32   ;;  %vm13_vm1 = vcmask 523648   ;;  %vm19_vm2 = vcmask 392448   ;;  %vm25_vm3 = vcmask 261248   ;;  %s55_s0 = inlined_call_operand.vmem [shape: s32[4,16], index: 0, kind: input, shape index: {}]   ;;  %s56_s1 = inlined_call_operand.vmem [shape: s32[64], index: 1, kind: output, shape index: {}]  }
   0x1   :  { %v4_v0 = vld [vmem:[%s55_s0] sm:$0xf]  ;;  %s36_s0 = smov 48  }
   0x2   :  { %5 = vst [vmem:[#allocation1] sm:$0xf] %v4_v0 }
   0x9   :  { %v10_v1 = vld [vmem:[#allocation1 + $0x3] sm:$0x1]   ;;  %v22_v2 = vld [vmem:[#allocation1 + $0x1] sm:$0x1]   ;;  %v6_v3 = vld [vmem:[#allocation1] sm:$0x1]  }
   0xa   :  { %11 = vrot.lane.b32.xlu0 %v10_v1, %s36_s0  ;;  %23 = vrot.lane.b32.xlu1 %v22_v2, %s37_s8  ;;  %v16_v4 = vld [vmem:[#allocation1 + $0x2] sm:$0x1]   ;;  %8 = vst.msk [vmem:[#allocation0] sm:$0x1] %vm7_vm0, %v6_v3  }
   0xe   :  { %17 = vrot.lane.b32.xlu0 %v16_v4, %s38_s9 }
  0x7c   :  { %v12_v5 = vpop.permute.xlu0 %11   ;;  %v24_v6 = vpop.permute.xlu1 %23  }
  0x7d   :  { %14 = vst.msk [vmem:[#allocation0] sm:$0x1] %vm13_vm1, %v12_v5  }
  0x80   :  { %v18_v7 = vpop.permute.xlu0 %17  }
  0x81   :  { %20 = vst.msk [vmem:[#allocation0] sm:$0x1] %vm19_vm2, %v18_v7  }
  0x82   :  { %26 = vst.msk [vmem:[#allocation0] sm:$0x1] %vm25_vm3, %v24_v6  }
  0x89   :  { %v30_v8 = vld [vmem:[#allocation0] sm:$0x1] }
  0x8a   :  { %32 = vst [vmem:[%s56_s1] sm:$0x1] %v30_v8 }

// kernel: transformer_block.1
= control target key start
LH: loop header
LB: loop body
LE: loop exit
PB: predicated region body
PF: predicated region fallthrough
CT: control target
= control target key end

     0   :  { %vm43_vm0 = vcmask 261120   ;;  %s1238_s26 = smov 32   ;;  %s1239_s15 = smov 96   ;;  %vm357_vm2 = vcmask 523264   ;;  %s1539_s0 = inlined_call_operand.vmem [shape: f32[16,32], index: 0, kind: input, shape index: {}]   ;;  %s1540_s1 = inlined_call_operand.vmem [shape: f32[224,128], index: 1, kind: input, shape index: {}]   ;;  %s1541_s2 = inlined_call_operand.vmem [shape: f32[16,32], index: 2, kind: output, shape index: {}]  }
   0x1   :  { %v1259_v0 = vld [vmem:[%s1540_s1 + $0xc0] sm:$0xff]  ;;  %v1267_v2 = vld [vmem:[%s1540_s1 + $0xc8] sm:$0xff]  ;;  %v1299_v20 = vld [vmem:[%s1540_s1 + $0x10] sm:$0xff]  ;;  %s1240_s16 = smov 64  }
   0x2   :  { %v39_v1 = vld [vmem:[%s1539_s0] sm:$0xff]  ;;  %v40_v4 = vld [vmem:[%s1539_s0 + $0x8] sm:$0xff]  ;;  %v1308_v23 = vld [vmem:[%s1540_s1 + $0x18] sm:$0xff] }
   0x3   :  { %v1270_v3 = vadd.f32 %v39_v1, %v1259_v0  ;;  %v1276_v5 = vadd.f32 %v40_v4, %v1267_v2  ;;  %v1289_v18 = vld [vmem:[%s1540_s1] sm:$0xff]  ;;  %v1294_v19 = vld [vmem:[%s1540_s1 + $0x8] sm:$0xff]  ;;  %v1073_v24 = vpack.c.bf16 %v1308_v23, %v1299_v20  ;;  %v1327_v27 = vld [vmem:[%s1540_s1 + $0x90] sm:$0xff] }
   0x4   :  { %v1208_v21 = vpack.i.bf16 %v1294_v19, %v1289_v18  ;;  %v1069_v22 = vpack.c.bf16 %v1294_v19, %v1289_v18  ;;  %v1315_v25 = vld [vmem:[%s1540_s1 + $0x88] sm:$0xff]  ;;  %v1322_v26 = vld [vmem:[%s1540_s1 + $0x80] sm:$0xff]  ;;  %v1341_v29 = vld [vmem:[%s1540_s1 + $0x98] sm:$0xff] }
   0x5   :  { %v44_v6 = vsel %vm43_vm0, %v1270_v3, 0.0  ;;  %v47_v7 = vsel %vm43_vm0, %v1276_v5, 0.0  ;;  %v1334_v28 = vld [vmem:[%s1540_s1 + $0xa0] sm:$0xff]  ;;  %v1348_v30 = vld [vmem:[%s1540_s1 + $0xb0] sm:$0xff]  ;;  %v1355_v31 = vld [vmem:[%s1540_s1 + $0xa8] sm:$0xff] }
   0x6   :  { %45 = vadd.xlane.f32.xlu0 %v44_v6  ;;  %1070 = vmatprep.subr.bf16.mxu0 %v1069_v22  ;;  %v1364_v32 = vld [vmem:[%s1540_s1 + $0xb8] sm:$0xff]  ;;  %v878_v49 = vld [vmem:[%s1540_s1 + $0xd0] ss:$0 sm:$0xff]  ;;  %vm1413_vm1 = vmpackc.low %vm43_vm0, %vm43_vm0 }
   0x7   :  { %1072 = vmatpush3.bf16.msra.mxu0 %v1069_v22 }
   0x8   :  { %1074 = vmatprep.subr.bf16.mxu0 %v1073_v24 }
   0xa   :  { %48 = vadd.xlane.f32.xlu0 %v47_v7 }
   0xb   :  { %1076 = vmatpush3.bf16.msra.mxu0 %v1073_v24 }
  0x20   :  { %164 = vrot.lane.b32.xlu0 %v1322_v26, %s1238_s26 }
  0x24   :  { %172 = vrot.lane.b32.xlu0 %v1334_v28, %s1238_s26 }
  0x28   :  { %176 = vrot.lane.b32.xlu0 %v1348_v30, %s1238_s26 }
  0x93   :  { %v46_v8 = vpop.xlane.xlu0 %45 }
  0x94   :  { %v51_v9 = vmul.f32 0.03125, %v46_v8 }
  0x96   :  { %v53_v10 = vsub.f32 %v1270_v3, %v51_v9 }
  0x97   :  { %v49_v11 = vpop.xlane.xlu0 %48 }
  0x98   :  { %v52_v12 = vmul.f32 0.03125, %v49_v11  ;;  %v55_v13 = vmul.f32 %v53_v10, %v53_v10 }
  0x9a   :  { %v54_v14 = vsub.f32 %v1276_v5, %v52_v12  ;;  %v57_v15 = vsel %vm43_vm0, %v55_v13, 0.0  ;;  %v1213_v12 = vpack.i.bf16 %v1308_v23, %v1299_v20  ;;  %v1117_v20 = vpack.c.bf16 %v1315_v25, %v1322_v26 }
  0x9b   :  { %58 = vadd.xlane.f32.xlu1 %v57_v15  ;;  %v165_v46 = vpop.permute.xlu0 %164  ;;  %v1121_v23 = vpack.c.bf16 %v1341_v29, %v1327_v27 }
  0x9c   :  { %v56_v16 = vmul.f32 %v54_v14, %v54_v14 }
  0x9e   :  { %v60_v17 = vsel %vm43_vm0, %v56_v16, 0.0 }
  0x9f   :  { %61 = vadd.xlane.f32.xlu1 %v60_v17  ;;  %v173_v48 = vpop.permute.xlu0 %172 }
  0xa3   :  { %v177_v55 = vpop.permute.xlu0 %176 }
  0xb0   :  { %166 = vrot.lane.b32.xlu1 %v1315_v25, %s1238_s26 }
  0xb4   :  { %168 = vrot.lane.b32.xlu1 %v1327_v27, %s1238_s26 }
  0xb8   :  { %170 = vrot.lane.b32.xlu1 %v1341_v29, %s1238_s26 }
  0xbc   :  { %174 = vrot.lane.b32.xlu1 %v1355_v31, %s1238_s26 }
  0xc0   :  { %178 = vrot.lane.b32.xlu1 %v1364_v32, %s1238_s26 }
 0x128   :  { %v59_v33 = vpop.xlane.xlu1 %58 }
 0x129   :  { %v63_v34 = vmul.f32 0.03125, %v59_v33 }
 0x12b   :  { %v65_v35 = vadd.f32 1e-05, %v63_v34 }
 0x12c   :  { %v62_v36 = vpop.xlane.xlu1 %61 }
 0x12d   :  { %1218 = vrsqrt.f32 %v65_v35  ;;  %v64_v37 = vmul.f32 0.03125, %v62_v36 }
 0x12f   :  { %v66_v38 = vadd.f32 1e-05, %v64_v37 }
 0x130   :  { %v167_v43 = vpop.permute.xlu1 %166 }
 0x131   :  { %1220 = vrsqrt.f32 %v66_v38 }
 0x134   :  { %v169_v44 = vpop.permute.xlu1 %168 }
 0x137   :  { %v1219_v39 = vpop.eup %1218 }
 0x138   :  { %v69_v40 = vmul.f32 %v1219_v39, %v53_v10  ;;  %v171_v45 = vpop.permute.xlu1 %170 }
 0x13a   :  { %968 = vmatprep.mubr.msk.f32.mxu0 %vm43_vm0, %v69_v40 }
 0x13b   :  { %v1221_v41 = vpop.eup %1220 }
 0x13c   :  { %v70_v42 = vmul.f32 %v1221_v41, %v54_v14  ;;  %v175_v47 = vpop.permute.xlu1 %174 }
 0x13e   :  { %969 = vmatmul.mubr.msk.f32.vlgmr.msra.gmra.mrb[0].mxu0 %vm43_vm0, %v70_v42 }
 0x140   :  { %v179_v54 = vpop.permute.xlu1 %178 }
 0x211   :  { %v970_v50 = vpop.f32.mrb[0].mxu0 }
 0x212   :  { %v1373_v51 = vadd.f32 %v970_v50, %v878_v49  ;;  %v147_v52 = vpop.f32.mrb[1].mxu0 }
 0x213   :  { %v1375_v53 = vadd.f32 %v878_v49, %v147_v52 }
 0x214   :  { %v191_v56 = vmul.f32 %v171_v45, %v1373_v51  ;;  %v189_v57 = vmul.f32 %v167_v43, %v1373_v51  ;;  %v195_v60 = vmul.f32 %v179_v54, %v1373_v51  ;;  %v193_v61 = vmul.f32 %v175_v47, %v1373_v51 }
 0x215   :  { %987 = vmatprep.mubr.msk.f32.mxu1 %vm43_vm0, %v1375_v53  ;;  %v190_v58 = vmul.f32 %v169_v44, %v1375_v53  ;;  %v188_v59 = vmul.f32 %v165_v46, %v1375_v53  ;;  %v194_v62 = vmul.f32 %v177_v55, %v1375_v53  ;;  %v192_v4 = vmul.f32 %v173_v48, %v1375_v53 }
 0x217   :  { %v1173_v63 = vpack.i.bf16 %v191_v56, %v190_v58  ;;  %v1168_v1 = vpack.i.bf16 %v189_v57, %v188_v59  ;;  %v1183_v6 = vpack.i.bf16 %v195_v60, %v194_v62  ;;  %v1178_v7 = vpack.i.bf16 %v193_v61, %v192_v4 }
 0x219   :  { %1174 = vrot.lane.b32.xlu1 %v1173_v63, %s1239_s15  ;;  %1169 = vrot.lane.b32.xlu0 %v1168_v1, %s1239_s15 }
 0x21d   :  { %1179 = vrot.lane.b32.xlu0 %v1178_v7, %s1239_s15  ;;  %1184 = vrot.lane.b32.xlu1 %v1183_v6, %s1239_s15 }
 0x221   :  { %254 = vrot.lane.b32.xlu0 %v1259_v0, %s1239_s15  ;;  %256 = vrot.lane.b32.xlu1 %v1267_v2, %s1239_s15 }
 0x225   :  { %196 = vrot.lane.b32.xlu0 %v1322_v26, %s1240_s16  ;;  %198 = vrot.lane.b32.xlu1 %v1315_v25, %s1240_s16  ;;  %v1129_v25 = vpack.c.bf16 %v1364_v32, %v1348_v30 }
 0x229   :  { %200 = vrot.lane.b32.xlu0 %v1327_v27, %s1240_s16  ;;  %202 = vrot.lane.b32.xlu1 %v1341_v29, %s1240_s16 }
 0x22d   :  { %204 = vrot.lane.b32.xlu0 %v1334_v28, %s1240_s16  ;;  %206 = vrot.lane.b32.xlu1 %v1355_v31, %s1240_s16 }
 0x231   :  { %208 = vrot.lane.b32.xlu0 %v1348_v30, %s1240_s16  ;;  %210 = vrot.lane.b32.xlu1 %v1364_v32, %s1240_s16 }
 0x28b   :  { %v1175_v0 = vpop.permute.xlu1 %1174  ;;  %v1170_v2 = vpop.permute.xlu0 %1169 }
 0x28c   :  { %v1177_v8 = vunpack.i.h.bf16 %v1175_v0  ;;  %v1176_v9 = vunpack.i.l.bf16 %v1175_v0  ;;  %v1172_v10 = vunpack.i.h.bf16 %v1170_v2  ;;  %v1171_v11 = vunpack.i.l.bf16 %v1170_v2 }
 0x28e   :  { %v1077_v13 = vpack.c.bf16 %v1172_v10, %v1171_v11  ;;  %v1083_v16 = vpack.c.bf16 %v1177_v8, %v1176_v9 }
 0x28f   :  { %v1185_v14 = vpop.permute.xlu1 %1184  ;;  %v1180_v15 = vpop.permute.xlu0 %1179 }
 0x290   :  { %1079 = vmatprep.subr.msk.bf16.mxu1 %vm1413_vm1, %v1077_v13  ;;  %v1182_v24 = vunpack.i.h.bf16 %v1180_v15  ;;  %v1181_v33 = vunpack.i.l.bf16 %v1180_v15  ;;  %v1187_v42 = vunpack.i.h.bf16 %v1185_v14  ;;  %v1186_v43 = vunpack.i.l.bf16 %v1185_v14 }
 0x291   :  { %1082 = vmatpush3.bf16.xpose.msk.msra.mxu1 %vm1413_vm1, %v1077_v13 }
 0x292   :  { %1085 = vmatprep.subr.msk.bf16.mxu1 %vm1413_vm1, %v1083_v16  ;;  %v1089_v36 = vpack.c.bf16 %v1182_v24, %v1181_v33  ;;  %v1095_v49 = vpack.c.bf16 %v1187_v42, %v1186_v43 }
 0x293   :  { %v257_v17 = vpop.permute.xlu1 %256  ;;  %v255_v22 = vpop.permute.xlu0 %254 }
 0x297   :  { %v199_v34 = vpop.permute.xlu1 %198  ;;  %v197_v35 = vpop.permute.xlu0 %196 }
 0x298   :  { %v221_v37 = vmul.f32 %v199_v34, %v1373_v51  ;;  %v220_v38 = vmul.f32 %v197_v35, %v1375_v53 }
 0x299   :  { %1088 = vmatpush3.bf16.xpose.msk.msra.mxu1 %vm1413_vm1, %v1083_v16 }
 0x29a   :  { %v1188_v39 = vpack.i.bf16 %v221_v37, %v220_v38  ;;  %1091 = vmatprep.subr.msk.bf16.mxu1 %vm1413_vm1, %v1089_v36  ;;  %v1125_v37 = vpack.c.bf16 %v1355_v31, %v1334_v28 }
 0x29b   :  { %v203_v40 = vpop.permute.xlu1 %202  ;;  %v201_v41 = vpop.permute.xlu0 %200 }
 0x29c   :  { %v223_v44 = vmul.f32 %v203_v40, %v1373_v51  ;;  %v222_v45 = vmul.f32 %v201_v41, %v1375_v53  ;;  %1189 = vrot.lane.b32.xlu0 %v1188_v39, %s1240_s16 }
 0x29e   :  { %v1193_v46 = vpack.i.bf16 %v223_v44, %v222_v45 }
 0x29f   :  { %v207_v47 = vpop.permute.xlu1 %206  ;;  %v205_v48 = vpop.permute.xlu0 %204 }
 0x2a0   :  { %v225_v50 = vmul.f32 %v207_v47, %v1373_v51  ;;  %v224_v52 = vmul.f32 %v205_v48, %v1375_v53  ;;  %1194 = vrot.lane.b32.xlu1 %v1193_v46, %s1240_s16  ;;  %v895_v47 = vld [vmem:[%s1540_s1 + $0xd8] ss:$0 sm:$0xff] }
 0x2a1   :  { %1094 = vmatpush3.bf16.xpose.msk.msra.mxu1 %vm1413_vm1, %v1089_v36 }
 0x2a2   :  { %v1198_v54 = vpack.i.bf16 %v225_v50, %v224_v52  ;;  %1097 = vmatprep.subr.msk.bf16.mxu1 %vm1413_vm1, %v1095_v49 }
 0x2a3   :  { %v209_v55 = vpop.permute.xlu0 %208  ;;  %v211_v56 = vpop.permute.xlu1 %210 }
 0x2a4   :  { %v227_v9 = vmul.f32 %v211_v56, %v1373_v51  ;;  %v226_v10 = vmul.f32 %v209_v55, %v1375_v53 }
 0x2a6   :  { %v1203_v11 = vpack.i.bf16 %v227_v9, %v226_v10 }
 0x2a9   :  { %1100 = vmatpush3.bf16.xpose.msk.msra.mxu1 %vm1413_vm1, %v1095_v49 }
 0x2b0   :  { %988 = vmatmul.mubr.msk.f32.vlgmr.msra.gmra.mrb[0].mxu1 %vm43_vm0, %v1373_v51 }
 0x30e   :  { %v1190_v57 = vpop.permute.xlu0 %1189 }
 0x30f   :  { %v1192_v58 = vunpack.i.h.bf16 %v1190_v57  ;;  %v1191_v59 = vunpack.i.l.bf16 %v1190_v57 }
 0x311   :  { %v1101_v60 = vpack.c.bf16 %v1192_v58, %v1191_v59 }
 0x312   :  { %v1195_v61 = vpop.permute.xlu1 %1194 }
 0x313   :  { %v1197_v62 = vunpack.i.h.bf16 %v1195_v61  ;;  %v1196_v63 = vunpack.i.l.bf16 %v1195_v61  ;;  %1102 = vmatprep.subr.bf16.mxu0 %v1101_v60 }
 0x314   :  { %1104 = vmatpush3.bf16.msra.mxu0 %v1101_v60 }
 0x315   :  { %v1105_v1 = vpack.c.bf16 %v1197_v62, %v1196_v63 }
 0x317   :  { %1106 = vmatprep.subr.bf16.mxu0 %v1105_v1 }
 0x318   :  { %1108 = vmatpush3.bf16.msra.mxu0 %v1105_v1 }
 0x383   :  { %v989_v4 = vpop.f32.mrb[0].mxu1 }
 0x384   :  { %v354_v6 = vadd.f32 %v989_v4, %v257_v17  ;;  %v348_v7 = vpop.f32.mrb[1].mxu1 }
 0x385   :  { %v349_v0 = vadd.f32 %v348_v7, %v255_v22  ;;  %v16_v7 = vld [vmem:[%s1540_s1 + $0x28] sm:$0xff] }
 0x386   :  { %v361_v2 = vsel %vm357_vm2, %v354_v6, -inf }
 0x387   :  { %362 = vmax.xlane.f32.xlu1 %v361_v2  ;;  %v358_v8 = vsel %vm357_vm2, %v349_v0, -inf }
 0x388   :  { %359 = vmax.xlane.f32.xlu0 %v358_v8  ;;  %v18_v8 = vld [vmem:[%s1540_s1 + $0x38] sm:$0xff] }
 0x398   :  { %1204 = vrot.lane.b32.xlu1 %v1203_v11, %s1240_s16 }
 0x39c   :  { %1214 = vrot.lane.b32.xlu1 %v1213_v12, %s1238_s26 }
 0x39e   :  { %1199 = vrot.lane.b32.xlu0 %v1198_v54, %s1240_s16 }
 0x3a2   :  { %1209 = vrot.lane.b32.xlu0 %v1208_v21, %s1238_s26 }
 0x414   :  { %v363_v13 = vpop.xlane.xlu1 %362 }
 0x415   :  { %v365_v14 = vsub.f32 %v354_v6, %v363_v13  ;;  %v360_v51 = vpop.xlane.xlu0 %359  ;;  %v15_v6 = vld [vmem:[%s1540_s1 + $0x20] sm:$0xff] }
 0x416   :  { %v364_v15 = vsub.f32 %v349_v0, %v360_v51  ;;  %v17_v0 = vld [vmem:[%s1540_s1 + $0x30] sm:$0xff]  ;;  %v1141_v2 = vpack.c.bf16 %v16_v7, %v15_v6 }
 0x417   :  { %v368_v53 = vmul.f32 1.442695, %v365_v14  ;;  %v1145_v9 = vpack.c.bf16 %v18_v8, %v17_v0 }
 0x418   :  { %v366_v16 = vmul.f32 1.442695, %v364_v15  ;;  %v1205_v17 = vpop.permute.xlu1 %1204 }
 0x419   :  { %v1207_v22 = vunpack.i.h.bf16 %v1205_v17  ;;  %v1200_v24 = vpop.permute.xlu0 %1199  ;;  %v1206_v33 = vunpack.i.l.bf16 %v1205_v17 }
 0x41a   :  { %1222 = vpow2.f32 %v366_v16  ;;  %v1202_v34 = vunpack.i.h.bf16 %v1200_v24  ;;  %v1201_v35 = vunpack.i.l.bf16 %v1200_v24  ;;  %v20_v24 = vld [vmem:[%s1540_s1 + $0x48] sm:$0xff] }
 0x41b   :  { %1224 = vpow2.f32 %v368_v53  ;;  %v1113_v19 = vpack.c.bf16 %v1207_v22, %v1206_v33  ;;  %v19_v22 = vld [vmem:[%s1540_s1 + $0x40] sm:$0xff] }
 0x41c   :  { %v1109_v18 = vpack.c.bf16 %v1202_v34, %v1201_v35  ;;  %v1215_v39 = vpop.permute.xlu1 %1214  ;;  %v1149_v33 = vpack.c.bf16 %v20_v24, %v19_v22  ;;  %v21_v34 = vld [vmem:[%s1540_s1 + $0x50] sm:$0xff]  ;;  %v22_v35 = vld [vmem:[%s1540_s1 + $0x58] sm:$0xff] }
 0x41d   :  { %v1210_v26 = vpop.permute.xlu0 %1209  ;;  %v1217_v40 = vunpack.i.h.bf16 %v1215_v39  ;;  %v1216_v41 = vunpack.i.l.bf16 %v1215_v39 }
 0x41e   :  { %1110 = vmatprep.subr.bf16.mxu0 %v1109_v18  ;;  %v1212_v27 = vunpack.i.h.bf16 %v1210_v26  ;;  %v1211_v29 = vunpack.i.l.bf16 %v1210_v26 }
 0x41f   :  { %1112 = vmatpush3.bf16.msra.mxu0 %v1109_v18  ;;  %v1137_v28 = vpack.c.bf16 %v1217_v40, %v1216_v41  ;;  %v1153_v18 = vpack.c.bf16 %v22_v35, %v21_v34 }
 0x420   :  { %1114 = vmatprep.subr.bf16.mxu0 %v1113_v19  ;;  %v1133_v38 = vpack.c.bf16 %v1212_v27, %v1211_v29 }
 0x422   :  { %1134 = vmatprep.subr.bf16.mxu1 %v1133_v38 }
 0x423   :  { %1116 = vmatpush3.bf16.msra.mxu0 %v1113_v19  ;;  %1136 = vmatpush3.bf16.msra.mxu1 %v1133_v38  ;;  %v23_v19 = vld [vmem:[%s1540_s1 + $0x60] sm:$0xff] }
 0x424   :  { %v1223_v21 = vpop.eup %1222  ;;  %1118 = vmatprep.subr.bf16.mxu0 %v1117_v20  ;;  %1138 = vmatprep.subr.bf16.mxu1 %v1137_v28 }
 0x425   :  { %v1225_v36 = vpop.eup %1224  ;;  %1006 = vmatprep.mubr.msk.f32.mxu0 %vm357_vm2, %v1223_v21 }
 0x426   :  { %1007 = vmatmul.mubr.msk.f32.vlgmr.msra.gmra.mrb[2].mxu0 %vm357_vm2, %v1225_v36 }
 0x427   :  { %1120 = vmatpush3.bf16.msra.mxu0 %v1117_v20  ;;  %1025 = vmatprep.mubr.msk.f32.mxu0 %vm357_vm2, %v1223_v21  ;;  %v24_v20 = vld [vmem:[%s1540_s1 + $0x68] sm:$0xff] }
 0x428   :  { %1122 = vmatprep.subr.bf16.mxu0 %v1121_v23  ;;  %1140 = vmatpush3.bf16.msra.mxu1 %v1137_v28  ;;  %v1157_v21 = vpack.c.bf16 %v24_v20, %v23_v19 }
 0x429   :  { %1150 = vmatprep.subr.bf16.mxu1 %v1149_v33 }
 0x42b   :  { %1124 = vmatpush3.bf16.msra.mxu0 %v1121_v23  ;;  %v25_v23 = vld [vmem:[%s1540_s1 + $0x70] sm:$0xff] }
 0x42c   :  { %1126 = vmatprep.subr.bf16.mxu0 %v1125_v37 }
 0x42f   :  { %1128 = vmatpush3.bf16.msra.mxu0 %v1125_v37 }
 0x430   :  { %1130 = vmatprep.subr.bf16.mxu0 %v1129_v25 }
 0x433   :  { %1132 = vmatpush3.bf16.msra.mxu0 %v1129_v25 }
 0x434   :  { %1142 = vmatprep.subr.bf16.mxu0 %v1141_v2 }
 0x436   :  { %1026 = vmatmul.mubr.msk.f32.vlgmr.msra.gmra.mrb[4].mxu0 %vm357_vm2, %v1225_v36  ;;  %v26_v36 = vld [vmem:[%s1540_s1 + $0x78] sm:$0xff] }
 0x437   :  { %1144 = vmatpush3.bf16.msra.mxu0 %v1141_v2  ;;  %v1161_v37 = vpack.c.bf16 %v26_v36, %v25_v23 }
 0x438   :  { %1146 = vmatprep.subr.bf16.mxu0 %v1145_v9 }
 0x43b   :  { %1148 = vmatpush3.bf16.msra.mxu0 %v1145_v9 }
 0x4f9   :  { %v1008_v31 = vpop.f32.mrb[2].mxu0 }
 0x4fa   :  { %v474_v42 = vpop.f32.mrb[3].mxu0 }
 0x509   :  { %v1027_v30 = vpop.f32.mrb[4].mxu0 }
 0x50a   :  { %1226 = vrcp.f32 %v1027_v30  ;;  %v549_v32 = vpop.f32.mrb[5].mxu0 }
 0x50b   :  { %1228 = vrcp.f32 %v549_v32 }
 0x514   :  { %v1227_v43 = vpop.eup %1226 }
 0x515   :  { %v1229_v44 = vpop.eup %1228  ;;  %v561_v45 = vmul.f32 %v1227_v43, %v1008_v31 }
 0x516   :  { %v560_v46 = vmul.f32 %v1229_v44, %v474_v42 }
 0x518   :  { %1036 = vmatprep.mubr.msk.f32.mxu1 %vm43_vm0, %v560_v46 }
 0x519   :  { %1037 = vmatmul.mubr.msk.f32.vlgmr.msra.gmra.mrb[2].mxu1 %vm43_vm0, %v561_v45 }
 0x51a   :  { %1152 = vmatpush3.bf16.msra.mxu1 %v1149_v33 }
 0x51b   :  { %1154 = vmatprep.subr.bf16.mxu1 %v1153_v18 }
 0x51e   :  { %1156 = vmatpush3.bf16.msra.mxu1 %v1153_v18 }
 0x51f   :  { %1158 = vmatprep.subr.bf16.mxu1 %v1157_v21 }
 0x522   :  { %1160 = vmatpush3.bf16.msra.mxu1 %v1157_v21 }
 0x523   :  { %1162 = vmatprep.subr.bf16.mxu1 %v1161_v37 }
 0x526   :  { %1164 = vmatpush3.bf16.msra.mxu1 %v1161_v37 }
 0x5ec   :  { %v1038_v48 = vpop.f32.mrb[2].mxu1 }
 0x5ed   :  { %v660_v49 = vadd.f32 %v1038_v48, %v895_v47  ;;  %v654_v50 = vpop.f32.mrb[3].mxu1 }
 0x5ee   :  { %v655_v52 = vadd.f32 %v895_v47, %v654_v50 }
 0x5ef   :  { %v1474_v54 = vadd.f32 %v660_v49, %v1276_v5 }
 0x5f0   :  { %v1477_v55 = vadd.f32 %v655_v52, %v1270_v3 }
 0x5f1   :  { %v668_v56 = vsel %vm43_vm0, %v1474_v54, 0.0 }
 0x5f2   :  { %669 = vadd.xlane.f32.xlu1 %v668_v56  ;;  %v665_v57 = vsel %vm43_vm0, %v1477_v55, 0.0 }
 0x5f3   :  { %666 = vadd.xlane.f32.xlu0 %v665_v57 }
 0x603   :  { %786 = vrot.lane.b32.xlu1 %v895_v47, %s1238_s26 }
 0x67f   :  { %v670_v58 = vpop.xlane.xlu1 %669 }
 0x680   :  { %v672_v59 = vmul.f32 0.03125, %v670_v58  ;;  %v667_v60 = vpop.xlane.xlu0 %666 }
 0x681   :  { %v671_v61 = vmul.f32 0.03125, %v667_v60 }
 0x682   :  { %v674_v5 = vsub.f32 %v1474_v54, %v672_v59 }
 0x683   :  { %v673_v62 = vsub.f32 %v1477_v55, %v671_v61  ;;  %v787_v45 = vpop.permute.xlu1 %786 }
 0x684   :  { %v676_v1 = vmul.f32 %v674_v5, %v674_v5 }
 0x685   :  { %v675_v3 = vmul.f32 %v673_v62, %v673_v62 }
 0x686   :  { %v680_v4 = vsel %vm43_vm0, %v676_v1, 0.0 }
 0x687   :  { %v677_v63 = vsel %vm43_vm0, %v675_v3, 0.0 }
 0x688   :  { %678 = vadd.xlane.f32.xlu0 %v677_v63 }
 0x68c   :  { %681 = vadd.xlane.f32.xlu0 %v680_v4 }
 0x6a2   :  { %692 = vrot.lane.b32.xlu0 %v895_v47, %s1239_s15 }
 0x715   :  { %v679_v10 = vpop.xlane.xlu0 %678 }
 0x716   :  { %v683_v11 = vmul.f32 0.03125, %v679_v10 }
 0x718   :  { %v685_v12 = vadd.f32 1e-05, %v683_v11 }
 0x719   :  { %v682_v13 = vpop.xlane.xlu0 %681 }
 0x71a   :  { %1230 = vrsqrt.f32 %v685_v12  ;;  %v684_v14 = vmul.f32 0.03125, %v682_v13 }
 0x71c   :  { %v686_v51 = vadd.f32 1e-05, %v684_v14 }
 0x71d   :  { %v693_v25 = vpop.permute.xlu0 %692 }
 0x71e   :  { %1232 = vrsqrt.f32 %v686_v51 }
 0x724   :  { %v1231_v15 = vpop.eup %1230 }
 0x725   :  { %v689_v53 = vmul.f32 %v1231_v15, %v673_v62 }
 0x727   :  { %1047 = vmatprep.mubr.msk.f32.mxu0 %vm43_vm0, %v689_v53 }
 0x728   :  { %v1233_v16 = vpop.eup %1232 }
 0x729   :  { %v690_v17 = vmul.f32 %v1233_v16, %v674_v5 }
 0x72b   :  { %1048 = vmatmul.mubr.msk.f32.vlgmr.msra.gmra.mrb[6].mxu0 %vm43_vm0, %v690_v17 }
 0x7fe   :  { %v1049_v26 = vpop.f32.mrb[6].mxu0 }
 0x7ff   :  { %v773_v27 = vadd.f32 %v1049_v26, %v693_v25  ;;  %v767_v29 = vpop.f32.mrb[7].mxu0 }
 0x800   :  { %v768_v38 = vadd.f32 %v767_v29, %v693_v25 }
 0x801   :  { %v779_v39 = vmul.f32 0.70710677, %v773_v27  ;;  %v777_v32 = vmul.f32 0.5, %v773_v27 }
 0x802   :  { %v778_v40 = vmul.f32 0.70710677, %v768_v38  ;;  %v776_v42 = vmul.f32 0.5, %v768_v38 }
 0x803   :  { %1234 = verf.f32 %v779_v39 }
 0x804   :  { %1236 = verf.f32 %v778_v40 }
 0x80d   :  { %v1235_v41 = vpop.eup %1234 }
 0x80e   :  { %v1237_v28 = vpop.eup %1236  ;;  %v783_v31 = vadd.f32 1.0, %v1235_v41 }
 0x80f   :  { %v782_v30 = vadd.f32 1.0, %v1237_v28 }
 0x810   :  { %v785_v44 = vmul.f32 %v783_v31, %v777_v32 }
 0x811   :  { %v784_v43 = vmul.f32 %v782_v30, %v776_v42 }
 0x813   :  { %1066 = vmatprep.mubr.msk.f32.mxu1 %vm357_vm2, %v784_v43 }
 0x814   :  { %1067 = vmatmul.mubr.msk.f32.vlgmr.msra.gmra.mrb[4].mxu1 %vm357_vm2, %v785_v44 }
 0x8e7   :  { %v1068_v46 = vpop.f32.mrb[4].mxu1 }
 0x8e8   :  { %v867_v47 = vadd.f32 %v1068_v46, %v787_v45  ;;  %v861_v48 = vpop.f32.mrb[5].mxu1 }
 0x8e9   :  { %v862_v49 = vadd.f32 %v861_v48, %v787_v45 }
 0x8ea   :  { %v871_v50 = vadd.f32 %v867_v47, %v1474_v54 }
 0x8eb   :  { %v870_v52 = vadd.f32 %v862_v49, %v1477_v55 }
 0x8ec   :  { %873 = vst.msk [vmem:[%s1541_s2 + $0x8] sm:$0xff] %vm43_vm0, %v871_v50 }
 0x8ed   :  { %872 = vst.msk [vmem:[%s1541_s2] sm:$0xff] %vm43_vm0, %v870_v52 }

</bundles_post_ra>
